<compile_context>
chip_gen: v6e
topology: v6e:2x2x1
jax: 0.10.0
libtpu: 0.0.40
codegen_flags: <defaults>
</compile_context>

<pallas_src>
import functools

import jax
import jax.numpy as jnp
from jax.experimental import pallas as pl
from jax.experimental.pallas import tpu as pltpu

IN_F = 4
HID_F = 16
OUT_F = 3
PACK = 32                      # samples packed per 128-lane row (32 * 4 = 128)
LANE_IN = PACK * IN_F          # 128
LANE_HID = PACK * HID_F        # 512
LANE_OUT = PACK * OUT_F        # 96


def mlp_kernel(x_ref, a_ref, b1_ref, c_ref, b2_ref, o_ref):
    # x_ref : (blk, 128)   a_ref : (128, 512)   b1_ref: (1, 512)
    # c_ref : (512, 96)    b2_ref: (1, 96)      o_ref : (blk, 96)
    x = x_ref[...]
    h = jnp.dot(x, a_ref[...], preferred_element_type=jnp.float32)
    h = jnp.maximum(h + b1_ref[...], 0.0)                      # ReLU
    y = jnp.dot(h, c_ref[...], preferred_element_type=jnp.float32) + b2_ref[...]
    o_ref[...] = y.astype(o_ref.dtype)


def _pick_block_rows(n_rows, max_rows):
    """Rows per grid step: multiple of 8 (or == n_rows), <= max_rows, and
    >= 2 grid steps whenever n_rows allows it (v7x megacore sharding)."""
    if n_rows <= 8:
        return n_rows                      # single block == full extent (legal)
    half = (-(-n_rows // 2) + 7) // 8 * 8  # ceil(n_rows/2) rounded up to 8
    return max(8, min(max_rows, half))


@functools.partial(jax.jit, static_argnames=("block_rows",))
def net_forward(x, w1, b1, w2, b2, *, block_rows=2048):
    """Forward pass of Net: fc2(relu(fc1(x))).

    Args (PyTorch layouts):
      x : (B, IN_F) float
      w1: (HID_F, IN_F), b1: (HID_F,)
      w2: (OUT_F, HID_F), b2: (OUT_F,)
    Returns: (B, OUT_F)
    """
    B = x.shape[0]

    # Pad only to a multiple of 32 samples (one packed row). No copy at all
    # when B is already a multiple of 32.
    B_pad = -(-B // PACK) * PACK
    if B_pad != B:
        x = jnp.pad(x, ((0, B_pad - B), (0, 0)))
    R = B_pad // PACK
    x2 = x.reshape(R, LANE_IN)                       # free contiguous reshape

    # Block-diagonal weights (tiny, resident in VMEM across the whole grid).
    eye = jnp.eye(PACK, dtype=w1.dtype)
    A = jnp.kron(eye, w1.T)                          # (128, 512)
    C = jnp.kron(eye, w2.T)                          # (512, 96)
    b1t = jnp.tile(b1, PACK).reshape(1, LANE_HID)    # (1, 512)
    b2t = jnp.tile(b2, PACK).reshape(1, LANE_OUT)    # (1, 96)

    blk = _pick_block_rows(R, block_rows)
    grid = (pl.cdiv(R, blk),)                        # partial last block masked

    y2 = pl.pallas_call(
        mlp_kernel,
        out_shape=jax.ShapeDtypeStruct((R, LANE_OUT), x.dtype),
        grid=grid,
        in_specs=[
            pl.BlockSpec((blk, LANE_IN), lambda i: (i, 0)),        # x (lane-dense)
            pl.BlockSpec((LANE_IN, LANE_HID), lambda i: (0, 0)),   # A (resident)
            pl.BlockSpec((1, LANE_HID), lambda i: (0, 0)),         # b1
            pl.BlockSpec((LANE_HID, LANE_OUT), lambda i: (0, 0)),  # C (resident)
            pl.BlockSpec((1, LANE_OUT), lambda i: (0, 0)),         # b2
        ],
        out_specs=pl.BlockSpec((blk, LANE_OUT), lambda i: (i, 0)),
        compiler_params=pltpu.CompilerParams(
            # Row tiles are independent -> shard across TensorCores (v7x).
            dimension_semantics=("parallel",),
            # ~12 MiB worst-case per-step footprint; 32 MiB scoped is safe on
            # v5e (128 MiB phys), v6e (128 MiB) and v7x (64 MiB per TC).
            vmem_limit_bytes=32 * 1024 * 1024,
        ),
    )(x2, A, b1t, C, b2t)

    y = y2.reshape(B_pad, OUT_F)                     # free contiguous reshape
    if B_pad != B:
        y = y[:B]
    return y


def init_params(key):
    """Deterministic init mimicking PyTorch nn.Linear defaults (uniform +-1/sqrt(fan_in))."""
    k1, k2, k3, k4 = jax.random.split(key, 4)
    bound1 = 1.0 / jnp.sqrt(IN_F)
    bound2 = 1.0 / jnp.sqrt(HID_F)
    # PyTorch layout: weight is (out_features, in_features), bias is (out_features,)
    w1 = jax.random.uniform(k1, (HID_F, IN_F), jnp.float32, -bound1, bound1)
    b1 = jax.random.uniform(k2, (HID_F,), jnp.float32, -bound1, bound1)
    w2 = jax.random.uniform(k3, (OUT_F, HID_F), jnp.float32, -bound2, bound2)
    b2 = jax.random.uniform(k4, (OUT_F,), jnp.float32, -bound2, bound2)
    return w1, b1, w2, b2


def reference_forward(x, w1, b1, w2, b2):
    h = jnp.maximum(x @ w1.T + b1, 0.0)
    return h @ w2.T + b2


if __name__ == "__main__":
    key = jax.random.PRNGKey(0)
    k_x, k_p = jax.random.split(key)
    w1, b1, w2, b2 = init_params(k_p)

    # Small batch that is NOT a multiple of 32 -> exercises the 32-sample pad.
    B = 100
    x = jax.random.normal(k_x, (B, IN_F), dtype=jnp.float32)
    out = jax.block_until_ready(net_forward(x, w1, b1, w2, b2))
    ref = reference_forward(x, w1, b1, w2, b2)
    assert out.shape == (B, OUT_F)
    assert jnp.allclose(out, ref, atol=1e-5, rtol=1e-5), "mismatch vs reference (B=100)"

    # Second small check: multi-step grid + masked partial last block.
    B2 = 600  # -> 19 packed rows, blk=16, grid=2, last block partial
    xb = jax.random.normal(k_x, (B2, IN_F), dtype=jnp.float32)
    out2 = jax.block_until_ready(net_forward(xb, w1, b1, w2, b2))
    ref2 = reference_forward(xb, w1, b1, w2, b2)
    assert out2.shape == (B2, OUT_F)
    assert jnp.allclose(out2, ref2, atol=1e-5, rtol=1e-5), "mismatch vs reference (B=600)"

    print("KERNEL_OK")
</pallas_src>

<mosaic_0001>
module attributes {stable_mosaic.version = 11 : i64} {
  func.func @mlp_kernel(%arg0: i32, %arg1: memref<4x128xf32, #tpu.memory_space<vmem>>, %arg2: memref<128x512xf32, #tpu.memory_space<vmem>>, %arg3: memref<1x512xf32, #tpu.memory_space<vmem>>, %arg4: memref<512x96xf32, #tpu.memory_space<vmem>>, %arg5: memref<1x96xf32, #tpu.memory_space<vmem>>, %arg6: memref<4x96xf32, #tpu.memory_space<vmem>>) attributes {dimension_semantics = [#tpu.dimension_semantics<parallel>], iteration_bounds = array<i64: 1>, scalar_prefetch = 0 : i64, scratch_operands = 0 : i64, tpu.core_type = #tpu.core_type<tc>, window_params = [{transform_indices = @transform_0, window_bounds = array<i64: 4, 128>}, {pipeline_mode = #tpu.pipeline_mode<synchronous>, transform_indices = @transform_1, window_bounds = array<i64: 128, 512>}, {pipeline_mode = #tpu.pipeline_mode<synchronous>, transform_indices = @transform_2, window_bounds = array<i64: 1, 512>}, {pipeline_mode = #tpu.pipeline_mode<synchronous>, transform_indices = @transform_3, window_bounds = array<i64: 512, 96>}, {pipeline_mode = #tpu.pipeline_mode<synchronous>, transform_indices = @transform_4, window_bounds = array<i64: 1, 96>}, {transform_indices = @transform_5, window_bounds = array<i64: 4, 96>}]} {
    %c0 = arith.constant 0 : index
    %c0_0 = arith.constant 0 : index
    %0 = vector.load %arg1[%c0, %c0_0] : memref<4x128xf32, #tpu.memory_space<vmem>>, vector<4x128xf32>
    %c0_1 = arith.constant 0 : index
    %c0_2 = arith.constant 0 : index
    %1 = vector.load %arg2[%c0_1, %c0_2] : memref<128x512xf32, #tpu.memory_space<vmem>>, vector<128x512xf32>
    %cst = arith.constant dense<0.000000e+00> : vector<4x512xf32>
    %2 = tpu.matmul %0, %1, %cst {dimension_numbers = #tpu.dot_dimension_numbers<[1], [0], [0], [1], [0, 0, 1, 1], [], []>} : vector<4x128xf32>, vector<128x512xf32>, vector<4x512xf32> -> vector<4x512xf32>
    %c0_3 = arith.constant 0 : index
    %c0_4 = arith.constant 0 : index
    %3 = vector.load %arg3[%c0_3, %c0_4] : memref<1x512xf32, #tpu.memory_space<vmem>>, vector<1x512xf32>
    %4 = vector.broadcast %3 : vector<1x512xf32> to vector<4x512xf32>
    %5 = arith.addf %2, %4 : vector<4x512xf32>
    %cst_5 = arith.constant 0.000000e+00 : f32
    %6 = vector.broadcast %cst_5 : f32 to vector<4x512xf32>
    %7 = arith.maximumf %5, %6 : vector<4x512xf32>
    %c0_6 = arith.constant 0 : index
    %c0_7 = arith.constant 0 : index
    %8 = vector.load %arg4[%c0_6, %c0_7] : memref<512x96xf32, #tpu.memory_space<vmem>>, vector<512x96xf32>
    %cst_8 = arith.constant dense<0.000000e+00> : vector<4x96xf32>
    %9 = tpu.matmul %7, %8, %cst_8 {dimension_numbers = #tpu.dot_dimension_numbers<[1], [0], [0], [1], [0, 0, 1, 1], [], []>} : vector<4x512xf32>, vector<512x96xf32>, vector<4x96xf32> -> vector<4x96xf32>
    %c0_9 = arith.constant 0 : index
    %c0_10 = arith.constant 0 : index
    %10 = vector.load %arg5[%c0_9, %c0_10] : memref<1x96xf32, #tpu.memory_space<vmem>>, vector<1x96xf32>
    %11 = vector.broadcast %10 : vector<1x96xf32> to vector<4x96xf32>
    %12 = arith.addf %9, %11 : vector<4x96xf32>
    %c0_11 = arith.constant 0 : index
    %c0_12 = arith.constant 0 : index
    %13 = vector.load %arg6[%c0_11, %c0_12] : memref<4x96xf32, #tpu.memory_space<vmem>>, vector<4x96xf32>
    tpu.vector_store %arg6[%c0_11, %c0_12], %12 {strides = array<i32>} : memref<4x96xf32, #tpu.memory_space<vmem>>, vector<4x96xf32>,
    return
  }
  func.func @transform_0(%arg0: i32) -> (i32, i32) {
    %c0_i32 = arith.constant 0 : i32
    %c0_i32_0 = arith.constant 0 : i32
    return %arg0, %c0_i32 : i32, i32
  }
  func.func @transform_1(%arg0: i32) -> (i32, i32) {
    %c0_i32 = arith.constant 0 : i32
    %c0_i32_0 = arith.constant 0 : i32
    %c0_i32_1 = arith.constant 0 : i32
    return %c0_i32, %c0_i32_0 : i32, i32
  }
  func.func @transform_2(%arg0: i32) -> (i32, i32) {
    %c0_i32 = arith.constant 0 : i32
    %c0_i32_0 = arith.constant 0 : i32
    %c0_i32_1 = arith.constant 0 : i32
    return %c0_i32, %c0_i32_0 : i32, i32
  }
  func.func @transform_3(%arg0: i32) -> (i32, i32) {
    %c0_i32 = arith.constant 0 : i32
    %c0_i32_0 = arith.constant 0 : i32
    %c0_i32_1 = arith.constant 0 : i32
    return %c0_i32, %c0_i32_0 : i32, i32
  }
  func.func @transform_4(%arg0: i32) -> (i32, i32) {
    %c0_i32 = arith.constant 0 : i32
    %c0_i32_0 = arith.constant 0 : i32
    %c0_i32_1 = arith.constant 0 : i32
    return %c0_i32, %c0_i32_0 : i32, i32
  }
  func.func @transform_5(%arg0: i32) -> (i32, i32) {
    %c0_i32 = arith.constant 0 : i32
    %c0_i32_0 = arith.constant 0 : i32
    return %arg0, %c0_i32 : i32, i32
  }
}

</mosaic_0001>

<bundles_post_ra>
// kernel: tile.13
= control target key start
LH: loop header
LB: loop body
LE: loop exit
PB: predicated region body
PF: predicated region fallthrough
CT: control target
= control target key end

     0   :  { %s40_s0 = inlined_call_operand.vmem [shape: f32[16], index: 0, kind: input, shape index: {}]   ;;  %s41_s1 = inlined_call_operand.vmem [shape: f32[32,16], index: 1, kind: output, shape index: {}]  }
   0x1   :  { %v4_v0 = vld [vmem:[%s40_s0] ss:$0 sm:$0xff] }
   0x2   :  { %5 = vst [vmem:[%s41_s1] sm:$0xff] %v4_v0  ;;  %12 = vst [vmem:[%s41_s1 + $0x8] sm:$0xff] %v4_v0 }
   0x3   :  { %13 = vst [vmem:[%s41_s1 + $0x10] sm:$0xff] %v4_v0  ;;  %14 = vst [vmem:[%s41_s1 + $0x18] sm:$0xff] %v4_v0 }

// kernel: tile.14
= control target key start
LH: loop header
LB: loop body
LE: loop exit
PB: predicated region body
PF: predicated region fallthrough
CT: control target
= control target key end

     0   :  { %s94_s8 = smov 112   ;;  %s95_s11 = smov 80   ;;  %vm3_vm0 = vcmask 130048   ;;  %vm9_vm1 = vcmask 1048448   ;;  %vm15_vm2 = vcmask 917248   ;;  %vm21_vm3 = vcmask 786048   ;;  %s147_s0 = inlined_call_operand.vmem [shape: f32[32,16], index: 0, kind: input, shape index: {}]   ;;  %s148_s1 = inlined_call_operand.vmem [shape: f32[1,512], index: 1, kind: output, shape index: {}]  }
   0x1   :  { %v77_v0 = vld [vmem:[%s147_s0 + $0x7] ss:$8 sm:$0xf]   ;;  %v79_v1 = vld [vmem:[%s147_s0 + $0x5] ss:$8 sm:$0xf]  }
   0x2   :  { %7 = vrot.lane.b32.xlu0 %v77_v0, %s94_s8  ;;  %19 = vrot.lane.b32.xlu1 %v79_v1, %s95_s11  ;;  %v78_v2 = vld [vmem:[%s147_s0 + $0x6] ss:$8 sm:$0xf]   ;;  %v80_v3 = vld [vmem:[%s147_s0 + $0x4] ss:$8 sm:$0xf]  }
   0x3   :  { %s96_s16 = smov 96   ;;  %v2_v4 = vld [vmem:[%s147_s0] ss:$8 sm:$0xf]   ;;  %s97_s19 = smov 64   ;;  %vm27_vm4 = vcmask 654848  }
   0x4   :  { %v81_v5 = vld [vmem:[%s147_s0 + $0x3] ss:$8 sm:$0xf]   ;;  %4 = vst.msk [vmem:[#allocation0] ss:$8 sm:$0xf] %vm3_vm0, %v2_v4  }
   0x5   :  { %v82_v6 = vld [vmem:[%s147_s0 + $0x2] ss:$8 sm:$0xf]   ;;  %s98_s24 = smov 48   ;;  %s99_s25 = smov 32   ;;  %vm33_vm5 = vcmask 523648  }
   0x6   :  { %13 = vrot.lane.b32.xlu0 %v78_v2, %s96_s16  ;;  %25 = vrot.lane.b32.xlu1 %v80_v3, %s97_s19  ;;  %v83_v7 = vld [vmem:[%s147_s0 + $0x1] ss:$8 sm:$0xf]   ;;  %s100_s0 = smov 16   ;;  %vm39_vm6 = vcmask 392448   ;;  %vm45_vm7 = vcmask 261248  }
   0xa   :  { %31 = vrot.lane.b32.xlu0 %v81_v5, %s98_s24  ;;  %37 = vrot.lane.b32.xlu1 %v82_v6, %s99_s25 }
   0xe   :  { %43 = vrot.lane.b32.xlu0 %v83_v7, %s100_s0 }
  0x74   :  { %v8_v8 = vpop.permute.xlu0 %7   ;;  %v20_v9 = vpop.permute.xlu1 %19  }
  0x75   :  { %10 = vst.msk [vmem:[#allocation0] ss:$8 sm:$0xf] %vm9_vm1, %v8_v8  }
  0x78   :  { %v14_v10 = vpop.permute.xlu0 %13   ;;  %v26_v11 = vpop.permute.xlu1 %25  }
  0x79   :  { %16 = vst.msk [vmem:[#allocation0] ss:$8 sm:$0xf] %vm15_vm2, %v14_v10  }
  0x7a   :  { %22 = vst.msk [vmem:[#allocation0] ss:$8 sm:$0xf] %vm21_vm3, %v20_v9  }
  0x7b   :  { %28 = vst.msk [vmem:[#allocation0] ss:$8 sm:$0xf] %vm27_vm4, %v26_v11  }
  0x7c   :  { %v32_v12 = vpop.permute.xlu0 %31   ;;  %v38_v13 = vpop.permute.xlu1 %37  }
  0x7d   :  { %34 = vst.msk [vmem:[#allocation0] ss:$8 sm:$0xf] %vm33_vm5, %v32_v12  }
  0x7e   :  { %40 = vst.msk [vmem:[#allocation0] ss:$8 sm:$0xf] %vm39_vm6, %v38_v13  }
  0x80   :  { %v44_v14 = vpop.permute.xlu0 %43  }
  0x81   :  { %46 = vst.msk [vmem:[#allocation0] ss:$8 sm:$0xf] %vm45_vm7, %v44_v14  }
  0x88   :  { %v51_v15 = vld [vmem:[#allocation0] sm:$0x1]  ;;  %v56_v16 = vld [vmem:[#allocation0 + $0x8] sm:$0x1]  ;;  %v62_v17 = vld [vmem:[#allocation0 + $0x10] sm:$0x1] }
  0x89   :  { %54 = vst [vmem:[%s148_s1] sm:$0x1] %v51_v15  ;;  %84 = vst [vmem:[%s148_s1 + $0x1] sm:$0x1] %v56_v16  ;;  %v69_v18 = vld [vmem:[#allocation0 + $0x18] sm:$0x1] }
  0x8a   :  { %85 = vst [vmem:[%s148_s1 + $0x2] sm:$0x1] %v62_v17  ;;  %86 = vst [vmem:[%s148_s1 + $0x3] sm:$0x1] %v69_v18 }

// kernel: tile.18
= control target key start
LH: loop header
LB: loop body
LE: loop exit
PB: predicated region body
PF: predicated region fallthrough
CT: control target
= control target key end

     0   :  { %s40_s0 = inlined_call_operand.vmem [shape: f32[3], index: 0, kind: input, shape index: {}]   ;;  %s41_s1 = inlined_call_operand.vmem [shape: f32[32,3], index: 1, kind: output, shape index: {}]  }
   0x1   :  { %v4_v0 = vld [vmem:[%s40_s0] ss:$0 sm:$0xff] }
   0x2   :  { %5 = vst [vmem:[%s41_s1] sm:$0xff] %v4_v0  ;;  %12 = vst [vmem:[%s41_s1 + $0x8] sm:$0xff] %v4_v0 }
   0x3   :  { %13 = vst [vmem:[%s41_s1 + $0x10] sm:$0xff] %v4_v0  ;;  %14 = vst [vmem:[%s41_s1 + $0x18] sm:$0xff] %v4_v0 }

// kernel: tile.19
= control target key start
LH: loop header
LB: loop body
LE: loop exit
PB: predicated region body
PF: predicated region fallthrough
CT: control target
= control target key end

     0   :  { %s261_s10 = smov 93   ;;  %s262_s11 = smov 87   ;;  %vm3_vm0 = vcmask 23552   ;;  %vm9_vm1 = vcmask 786152   ;;  %vm15_vm2 = vcmask 761552   ;;  %vm21_vm3 = vcmask 736952   ;;  %s401_s0 = inlined_call_operand.vmem [shape: f32[32,3], index: 0, kind: input, shape index: {}]   ;;  %s402_s1 = inlined_call_operand.vmem [shape: f32[1,96], index: 1, kind: output, shape index: {}]  }
   0x1   :  { %v199_v0 = vld [vmem:[%s401_s0 + $0x1f] sm:$0x1]   ;;  %v201_v1 = vld [vmem:[%s401_s0 + $0x1d] sm:$0x1]   ;;  %v200_v2 = vld [vmem:[%s401_s0 + $0x1e] sm:$0x1]  }
   0x2   :  { %7 = vrot.lane.b32.xlu0 %v199_v0, %s261_s10  ;;  %19 = vrot.lane.b32.xlu1 %v201_v1, %s262_s11  ;;  %v202_v3 = vld [vmem:[%s401_s0 + $0x1c] sm:$0x1]   ;;  %s263_s16 = smov 90   ;;  %s264_s17 = smov 84   ;;  %v203_v4 = vld [vmem:[%s401_s0 + $0x1b] sm:$0x1]  }
   0x3   :  { %v204_v5 = vld [vmem:[%s401_s0 + $0x1a] sm:$0x1]   ;;  %s265_s22 = smov 81   ;;  %s266_s23 = smov 78   ;;  %v205_v6 = vld [vmem:[%s401_s0 + $0x19] sm:$0x1]  }
   0x4   :  { %v206_v7 = vld [vmem:[%s401_s0 + $0x18] sm:$0x1]   ;;  %s267_s28 = smov 75   ;;  %s268_s29 = smov 72   ;;  %v207_v8 = vld [vmem:[%s401_s0 + $0x17] sm:$0x1]  }
   0x5   :  { %v208_v9 = vld [vmem:[%s401_s0 + $0x16] sm:$0x1]   ;;  %v2_v10 = vld [vmem:[%s401_s0] sm:$0x1]   ;;  %s269_s7 = smov 69   ;;  %s270_s8 = smov 66  }
   0x6   :  { %13 = vrot.lane.b32.xlu0 %v200_v2, %s263_s16  ;;  %25 = vrot.lane.b32.xlu1 %v202_v3, %s264_s17  ;;  %4 = vst.msk [vmem:[#allocation0] sm:$0x1] %vm3_vm0, %v2_v10   ;;  %v209_v11 = vld [vmem:[%s401_s0 + $0x15] sm:$0x1]   ;;  %v210_v12 = vld [vmem:[%s401_s0 + $0x14] sm:$0x1]  }
   0x7   :  { %s271_s13 = smov 63   ;;  %s272_s14 = smov 60   ;;  %v211_v13 = vld [vmem:[%s401_s0 + $0x13] sm:$0x1]   ;;  %v212_v14 = vld [vmem:[%s401_s0 + $0x12] sm:$0x1]  }
   0x8   :  { %s273_s19 = smov 57   ;;  %s274_s20 = smov 54   ;;  %v213_v15 = vld [vmem:[%s401_s0 + $0x11] sm:$0x1]   ;;  %v214_v16 = vld [vmem:[%s401_s0 + $0x10] sm:$0x1]  }
   0x9   :  { %s275_s25 = smov 51   ;;  %s276_s26 = smov 48   ;;  %v215_v17 = vld [vmem:[%s401_s0 + $0xf] sm:$0x1]   ;;  %v216_v18 = vld [vmem:[%s401_s0 + $0xe] sm:$0x1]  }
   0xa   :  { %31 = vrot.lane.b32.xlu0 %v203_v4, %s265_s22  ;;  %37 = vrot.lane.b32.xlu1 %v204_v5, %s266_s23  ;;  %s277_s2 = smov 45   ;;  %s278_s3 = smov 42   ;;  %v217_v19 = vld [vmem:[%s401_s0 + $0xd] sm:$0x1]   ;;  %v218_v20 = vld [vmem:[%s401_s0 + $0xc] sm:$0x1]  }
   0xb   :  { %s280_s9 = smov 36   ;;  %v219_v21 = vld [vmem:[%s401_s0 + $0xb] sm:$0x1]   ;;  %v220_v22 = vld [vmem:[%s401_s0 + $0xa] sm:$0x1]   ;;  %s282_s15 = smov 30  }
   0xc   :  { %v221_v23 = vld [vmem:[%s401_s0 + $0x9] sm:$0x1]   ;;  %v222_v24 = vld [vmem:[%s401_s0 + $0x8] sm:$0x1]   ;;  %s284_s21 = smov 24   ;;  %s286_s27 = smov 18  }
   0xd   :  { %v223_v25 = vld [vmem:[%s401_s0 + $0x7] sm:$0x1]   ;;  %v224_v26 = vld [vmem:[%s401_s0 + $0x6] sm:$0x1]   ;;  %v225_v27 = vld [vmem:[%s401_s0 + $0x5] sm:$0x1]  }
   0xe   :  { %43 = vrot.lane.b32.xlu0 %v205_v6, %s267_s28  ;;  %49 = vrot.lane.b32.xlu1 %v206_v7, %s268_s29  ;;  %v226_v28 = vld [vmem:[%s401_s0 + $0x4] sm:$0x1]   ;;  %s288_s4 = smov 12   ;;  %v227_v29 = vld [vmem:[%s401_s0 + $0x3] sm:$0x1]   ;;  %s290_s10 = smov 6  }
   0xf   :  { %v228_v30 = vld [vmem:[%s401_s0 + $0x2] sm:$0x1]   ;;  %v229_v31 = vld [vmem:[%s401_s0 + $0x1] sm:$0x1]   ;;  %s291_s0 = smov 3   ;;  %vm27_vm4 = vcmask 712352  }
  0x10   :  { %vm33_vm5 = vcmask 687752   ;;  %vm39_vm6 = vcmask 663152   ;;  %vm45_vm7 = vcmask 638552   ;;  %vm51_vm8 = vcmask 613952  }
  0x11   :  { %vm57_vm9 = vcmask 589352   ;;  %vm63_vm10 = vcmask 564752   ;;  %vm69_vm11 = vcmask 540152   ;;  %vm75_vm12 = vcmask 515552  }
  0x12   :  { %55 = vrot.lane.b32.xlu0 %v207_v8, %s269_s7  ;;  %61 = vrot.lane.b32.xlu1 %v208_v9, %s270_s8  ;;  %s279_s8 = smov 39   ;;  %vm81_vm13 = vcmask 490952   ;;  %vm87_vm14 = vcmask 466352   ;;  %vm93_vm15 = vcmask 441752   ;;  %vm99_vm0 = vcmask 417152  }
  0x16   :  { %67 = vrot.lane.b32.xlu0 %v209_v11, %s271_s13  ;;  %73 = vrot.lane.b32.xlu1 %v210_v12, %s272_s14  ;;  %s281_s14 = smov 33  }
  0x1a   :  { %79 = vrot.lane.b32.xlu0 %v211_v13, %s273_s19  ;;  %85 = vrot.lane.b32.xlu1 %v212_v14, %s274_s20  ;;  %s283_s20 = smov 27  }
  0x1e   :  { %91 = vrot.lane.b32.xlu0 %v213_v15, %s275_s25  ;;  %97 = vrot.lane.b32.xlu1 %v214_v16, %s276_s26  ;;  %s285_s26 = smov 21  }
  0x22   :  { %103 = vrot.lane.b32.xlu0 %v215_v17, %s277_s2  ;;  %109 = vrot.lane.b32.xlu1 %v216_v18, %s278_s3  ;;  %s287_s3 = smov 15  }
  0x26   :  { %115 = vrot.lane.b32.xlu0 %v217_v19, %s279_s8  ;;  %121 = vrot.lane.b32.xlu1 %v218_v20, %s280_s9  ;;  %s289_s9 = smov 9  }
  0x2a   :  { %127 = vrot.lane.b32.xlu0 %v219_v21, %s281_s14  ;;  %133 = vrot.lane.b32.xlu1 %v220_v22, %s282_s15 }
  0x2e   :  { %139 = vrot.lane.b32.xlu0 %v221_v23, %s283_s20  ;;  %145 = vrot.lane.b32.xlu1 %v222_v24, %s284_s21 }
  0x32   :  { %151 = vrot.lane.b32.xlu0 %v223_v25, %s285_s26  ;;  %157 = vrot.lane.b32.xlu1 %v224_v26, %s286_s27 }
  0x36   :  { %163 = vrot.lane.b32.xlu0 %v225_v27, %s287_s3  ;;  %169 = vrot.lane.b32.xlu1 %v226_v28, %s288_s4 }
  0x3a   :  { %175 = vrot.lane.b32.xlu0 %v227_v29, %s289_s9  ;;  %181 = vrot.lane.b32.xlu1 %v228_v30, %s290_s10 }
  0x3e   :  { %187 = vrot.lane.b32.xlu0 %v229_v31, %s291_s0 }
  0x74   :  { %v8_v32 = vpop.permute.xlu0 %7   ;;  %v20_v33 = vpop.permute.xlu1 %19  }
  0x75   :  { %10 = vst.msk [vmem:[#allocation0] sm:$0x1] %vm9_vm1, %v8_v32   ;;  %vm105_vm1 = vcmask 392552  }
  0x78   :  { %v14_v34 = vpop.permute.xlu0 %13   ;;  %v26_v35 = vpop.permute.xlu1 %25  }
  0x79   :  { %16 = vst.msk [vmem:[#allocation0] sm:$0x1] %vm15_vm2, %v14_v34   ;;  %vm111_vm2 = vcmask 367952  }
  0x7a   :  { %22 = vst.msk [vmem:[#allocation0] sm:$0x1] %vm21_vm3, %v20_v33   ;;  %vm117_vm3 = vcmask 343352  }
  0x7b   :  { %28 = vst.msk [vmem:[#allocation0] sm:$0x1] %vm27_vm4, %v26_v35   ;;  %vm123_vm4 = vcmask 318752  }
  0x7c   :  { %v32_v36 = vpop.permute.xlu0 %31   ;;  %v38_v37 = vpop.permute.xlu1 %37  }
  0x7d   :  { %34 = vst.msk [vmem:[#allocation0] sm:$0x1] %vm33_vm5, %v32_v36   ;;  %vm129_vm5 = vcmask 294152  }
  0x7e   :  { %40 = vst.msk [vmem:[#allocation0] sm:$0x1] %vm39_vm6, %v38_v37   ;;  %vm135_vm6 = vcmask 269552  }
  0x80   :  { %v44_v38 = vpop.permute.xlu0 %43   ;;  %v50_v39 = vpop.permute.xlu1 %49  }
  0x81   :  { %46 = vst.msk [vmem:[#allocation0] sm:$0x1] %vm45_vm7, %v44_v38   ;;  %vm141_vm7 = vcmask 244952  }
  0x82   :  { %52 = vst.msk [vmem:[#allocation0] sm:$0x1] %vm51_vm8, %v50_v39   ;;  %vm147_vm8 = vcmask 220352  }
  0x84   :  { %v56_v40 = vpop.permute.xlu0 %55   ;;  %v62_v41 = vpop.permute.xlu1 %61  }
  0x85   :  { %58 = vst.msk [vmem:[#allocation0] sm:$0x1] %vm57_vm9, %v56_v40   ;;  %vm153_vm9 = vcmask 195752  }
  0x86   :  { %64 = vst.msk [vmem:[#allocation0] sm:$0x1] %vm63_vm10, %v62_v41   ;;  %vm159_vm10 = vcmask 171152  }
  0x88   :  { %v68_v42 = vpop.permute.xlu0 %67   ;;  %v74_v43 = vpop.permute.xlu1 %73  }
  0x89   :  { %70 = vst.msk [vmem:[#allocation0] sm:$0x1] %vm69_vm11, %v68_v42   ;;  %vm165_vm11 = vcmask 146552  }
  0x8a   :  { %76 = vst.msk [vmem:[#allocation0] sm:$0x1] %vm75_vm12, %v74_v43   ;;  %vm171_vm12 = vcmask 121952  }
  0x8c   :  { %v80_v44 = vpop.permute.xlu0 %79   ;;  %v86_v45 = vpop.permute.xlu1 %85  }
  0x8d   :  { %82 = vst.msk [vmem:[#allocation0] sm:$0x1] %vm81_vm13, %v80_v44   ;;  %vm177_vm13 = vcmask 97352  }
  0x8e   :  { %88 = vst.msk [vmem:[#allocation0] sm:$0x1] %vm87_vm14, %v86_v45   ;;  %vm183_vm14 = vcmask 72752  }
  0x90   :  { %v92_v46 = vpop.permute.xlu0 %91   ;;  %v98_v47 = vpop.permute.xlu1 %97  }
  0x91   :  { %94 = vst.msk [vmem:[#allocation0] sm:$0x1] %vm93_vm15, %v92_v46   ;;  %vm189_vm15 = vcmask 48152  }
  0x92   :  { %100 = vst.msk [vmem:[#allocation0] sm:$0x1] %vm99_vm0, %v98_v47  }
  0x94   :  { %v104_v48 = vpop.permute.xlu0 %103   ;;  %v110_v49 = vpop.permute.xlu1 %109  }
  0x95   :  { %106 = vst.msk [vmem:[#allocation0] sm:$0x1] %vm105_vm1, %v104_v48  }
  0x96   :  { %112 = vst.msk [vmem:[#allocation0] sm:$0x1] %vm111_vm2, %v110_v49  }
  0x98   :  { %v116_v50 = vpop.permute.xlu0 %115   ;;  %v122_v51 = vpop.permute.xlu1 %121  }
  0x99   :  { %118 = vst.msk [vmem:[#allocation0] sm:$0x1] %vm117_vm3, %v116_v50  }
  0x9a   :  { %124 = vst.msk [vmem:[#allocation0] sm:$0x1] %vm123_vm4, %v122_v51  }
  0x9c   :  { %v128_v52 = vpop.permute.xlu0 %127   ;;  %v134_v53 = vpop.permute.xlu1 %133  }
  0x9d   :  { %130 = vst.msk [vmem:[#allocation0] sm:$0x1] %vm129_vm5, %v128_v52  }
  0x9e   :  { %136 = vst.msk [vmem:[#allocation0] sm:$0x1] %vm135_vm6, %v134_v53  }
  0xa0   :  { %v140_v54 = vpop.permute.xlu0 %139   ;;  %v146_v55 = vpop.permute.xlu1 %145  }
  0xa1   :  { %142 = vst.msk [vmem:[#allocation0] sm:$0x1] %vm141_vm7, %v140_v54  }
  0xa2   :  { %148 = vst.msk [vmem:[#allocation0] sm:$0x1] %vm147_vm8, %v146_v55  }
  0xa4   :  { %v152_v56 = vpop.permute.xlu0 %151   ;;  %v158_v57 = vpop.permute.xlu1 %157  }
  0xa5   :  { %154 = vst.msk [vmem:[#allocation0] sm:$0x1] %vm153_vm9, %v152_v56  }
  0xa6   :  { %160 = vst.msk [vmem:[#allocation0] sm:$0x1] %vm159_vm10, %v158_v57  }
  0xa8   :  { %v164_v58 = vpop.permute.xlu0 %163   ;;  %v170_v59 = vpop.permute.xlu1 %169  }
  0xa9   :  { %166 = vst.msk [vmem:[#allocation0] sm:$0x1] %vm165_vm11, %v164_v58  }
  0xaa   :  { %172 = vst.msk [vmem:[#allocation0] sm:$0x1] %vm171_vm12, %v170_v59  }
  0xac   :  { %v176_v60 = vpop.permute.xlu0 %175   ;;  %v182_v61 = vpop.permute.xlu1 %181  }
  0xad   :  { %178 = vst.msk [vmem:[#allocation0] sm:$0x1] %vm177_vm13, %v176_v60  }
  0xae   :  { %184 = vst.msk [vmem:[#allocation0] sm:$0x1] %vm183_vm14, %v182_v61  }
  0xb0   :  { %v188_v62 = vpop.permute.xlu0 %187  }
  0xb1   :  { %190 = vst.msk [vmem:[#allocation0] sm:$0x1] %vm189_vm15, %v188_v62  }
  0xb8   :  { %v195_v63 = vld [vmem:[#allocation0] sm:$0x1] }
  0xb9   :  { %198 = vst [vmem:[%s402_s1] sm:$0x1] %v195_v63 }

// kernel: net_forward.1
= control target key start
LH: loop header
LB: loop body
LE: loop exit
PB: predicated region body
PF: predicated region fallthrough
CT: control target
= control target key end

     0   :  { %v542_v3 = vmov 0.0   ;;  %vm464_vm0 = vcmask 781312   ;;  %s969_s1 = inlined_call_operand.vmem [shape: f32[128,512], index: 1, kind: input, shape index: {}]   ;;  %s970_s0 = inlined_call_operand.vmem [shape: f32[4,128], index: 0, kind: input, shape index: {}]   ;;  %s971_s3 = inlined_call_operand.vmem [shape: f32[512,96], index: 3, kind: input, shape index: {}]   ;;  %s972_s2 = inlined_call_operand.vmem [shape: f32[1,512], index: 2, kind: input, shape index: {}]   ;;  %s973_s4 = inlined_call_operand.vmem [shape: f32[1,96], index: 4, kind: input, shape index: {}]   ;;  %s974_s5 = inlined_call_operand.vmem [shape: f32[4,96], index: 5, kind: output, shape index: {}]  }
   0x1   :  { %v82_v0 = vld [vmem:[%s969_s1 + $0x1e8] sm:$0xff]  ;;  %v84_v1 = vld [vmem:[%s969_s1 + $0x1f8] sm:$0xff]  ;;  %v81_v2 = vld [vmem:[%s969_s1 + $0x1e0] sm:$0xff]  ;;  %171 = vmatprep.mubr.f32.mxu0 %v542_v3  ;;  %242 = vmatprep.mubr.f32.mxu1 %v542_v3 }
   0x2   :  { %107 = vmatprep.subr.mxu0 %v82_v0  ;;  %178 = vmatprep.subr.mxu1 %v84_v1  ;;  %v83_v4 = vld [vmem:[%s969_s1 + $0x1f0] sm:$0xff]  ;;  %v78_v5 = vld [vmem:[%s969_s1 + $0x1c8] sm:$0xff]  ;;  %v80_v6 = vld [vmem:[%s969_s1 + $0x1d8] sm:$0xff] }
   0x3   :  { %108 = vmatpush1.msra.mxu0 %v81_v2  ;;  %179 = vmatpush1.msra.mxu1 %v83_v4  ;;  %v77_v7 = vld [vmem:[%s969_s1 + $0x1c0] sm:$0xff]  ;;  %v79_v8 = vld [vmem:[%s969_s1 + $0x1d0] sm:$0xff]  ;;  %v74_v9 = vld [vmem:[%s969_s1 + $0x1a8] sm:$0xff] }
   0x4   :  { %109 = vmatprep.subr.mxu0 %v78_v5  ;;  %180 = vmatprep.subr.mxu1 %v80_v6  ;;  %v76_v10 = vld [vmem:[%s969_s1 + $0x1b8] sm:$0xff]  ;;  %v73_v11 = vld [vmem:[%s969_s1 + $0x1a0] sm:$0xff]  ;;  %v75_v12 = vld [vmem:[%s969_s1 + $0x1b0] sm:$0xff] }
   0x5   :  { %110 = vmatpush1.msra.mxu0 %v77_v7  ;;  %181 = vmatpush1.msra.mxu1 %v79_v8  ;;  %v70_v13 = vld [vmem:[%s969_s1 + $0x188] sm:$0xff]  ;;  %v72_v14 = vld [vmem:[%s969_s1 + $0x198] sm:$0xff]  ;;  %v69_v15 = vld [vmem:[%s969_s1 + $0x180] sm:$0xff] }
   0x6   :  { %111 = vmatprep.subr.mxu0 %v74_v9  ;;  %182 = vmatprep.subr.mxu1 %v76_v10  ;;  %v71_v16 = vld [vmem:[%s969_s1 + $0x190] sm:$0xff]  ;;  %v66_v17 = vld [vmem:[%s969_s1 + $0x168] sm:$0xff]  ;;  %v68_v18 = vld [vmem:[%s969_s1 + $0x178] sm:$0xff] }
   0x7   :  { %112 = vmatpush1.msra.mxu0 %v73_v11  ;;  %183 = vmatpush1.msra.mxu1 %v75_v12  ;;  %v65_v19 = vld [vmem:[%s969_s1 + $0x160] sm:$0xff]  ;;  %v67_v20 = vld [vmem:[%s969_s1 + $0x170] sm:$0xff]  ;;  %v62_v21 = vld [vmem:[%s969_s1 + $0x148] sm:$0xff] }
   0x8   :  { %113 = vmatprep.subr.mxu0 %v70_v13  ;;  %184 = vmatprep.subr.mxu1 %v72_v14  ;;  %v64_v22 = vld [vmem:[%s969_s1 + $0x158] sm:$0xff]  ;;  %v61_v23 = vld [vmem:[%s969_s1 + $0x140] sm:$0xff]  ;;  %v63_v24 = vld [vmem:[%s969_s1 + $0x150] sm:$0xff] }
   0x9   :  { %114 = vmatpush1.msra.mxu0 %v69_v15  ;;  %185 = vmatpush1.msra.mxu1 %v71_v16  ;;  %v58_v25 = vld [vmem:[%s969_s1 + $0x128] sm:$0xff]  ;;  %v60_v26 = vld [vmem:[%s969_s1 + $0x138] sm:$0xff]  ;;  %v57_v27 = vld [vmem:[%s969_s1 + $0x120] sm:$0xff] }
   0xa   :  { %115 = vmatprep.subr.mxu0 %v66_v17  ;;  %186 = vmatprep.subr.mxu1 %v68_v18  ;;  %v59_v28 = vld [vmem:[%s969_s1 + $0x130] sm:$0xff]  ;;  %v54_v29 = vld [vmem:[%s969_s1 + $0x108] sm:$0xff]  ;;  %v56_v30 = vld [vmem:[%s969_s1 + $0x118] sm:$0xff] }
   0xb   :  { %116 = vmatpush1.msra.mxu0 %v65_v19  ;;  %187 = vmatpush1.msra.mxu1 %v67_v20  ;;  %v53_v31 = vld [vmem:[%s969_s1 + $0x100] sm:$0xff]  ;;  %v55_v32 = vld [vmem:[%s969_s1 + $0x110] sm:$0xff]  ;;  %v50_v33 = vld [vmem:[%s969_s1 + $0xe8] sm:$0xff] }
   0xc   :  { %117 = vmatprep.subr.mxu0 %v62_v21  ;;  %188 = vmatprep.subr.mxu1 %v64_v22  ;;  %v52_v34 = vld [vmem:[%s969_s1 + $0xf8] sm:$0xff]  ;;  %v49_v35 = vld [vmem:[%s969_s1 + $0xe0] sm:$0xff]  ;;  %v51_v36 = vld [vmem:[%s969_s1 + $0xf0] sm:$0xff] }
   0xd   :  { %118 = vmatpush1.msra.mxu0 %v61_v23  ;;  %189 = vmatpush1.msra.mxu1 %v63_v24  ;;  %v46_v37 = vld [vmem:[%s969_s1 + $0xc8] sm:$0xff]  ;;  %v48_v38 = vld [vmem:[%s969_s1 + $0xd8] sm:$0xff]  ;;  %v45_v39 = vld [vmem:[%s969_s1 + $0xc0] sm:$0xff] }
   0xe   :  { %119 = vmatprep.subr.mxu0 %v58_v25  ;;  %190 = vmatprep.subr.mxu1 %v60_v26  ;;  %v47_v40 = vld [vmem:[%s969_s1 + $0xd0] sm:$0xff]  ;;  %v42_v41 = vld [vmem:[%s969_s1 + $0xa8] sm:$0xff]  ;;  %v44_v42 = vld [vmem:[%s969_s1 + $0xb8] sm:$0xff] }
   0xf   :  { %120 = vmatpush1.msra.mxu0 %v57_v27  ;;  %191 = vmatpush1.msra.mxu1 %v59_v28  ;;  %v41_v43 = vld [vmem:[%s969_s1 + $0xa0] sm:$0xff]  ;;  %v43_v44 = vld [vmem:[%s969_s1 + $0xb0] sm:$0xff]  ;;  %v38_v45 = vld [vmem:[%s969_s1 + $0x88] sm:$0xff] }
  0x10   :  { %121 = vmatprep.subr.mxu0 %v54_v29  ;;  %192 = vmatprep.subr.mxu1 %v56_v30  ;;  %v40_v46 = vld [vmem:[%s969_s1 + $0x98] sm:$0xff]  ;;  %v37_v47 = vld [vmem:[%s969_s1 + $0x80] sm:$0xff]  ;;  %v39_v48 = vld [vmem:[%s969_s1 + $0x90] sm:$0xff] }
  0x11   :  { %122 = vmatpush1.msra.mxu0 %v53_v31  ;;  %193 = vmatpush1.msra.mxu1 %v55_v32  ;;  %v34_v49 = vld [vmem:[%s969_s1 + $0x68] sm:$0xff]  ;;  %v36_v50 = vld [vmem:[%s969_s1 + $0x78] sm:$0xff]  ;;  %v33_v51 = vld [vmem:[%s969_s1 + $0x60] sm:$0xff] }
  0x12   :  { %123 = vmatprep.subr.mxu0 %v50_v33  ;;  %194 = vmatprep.subr.mxu1 %v52_v34  ;;  %v35_v52 = vld [vmem:[%s969_s1 + $0x70] sm:$0xff]  ;;  %v30_v53 = vld [vmem:[%s969_s1 + $0x48] sm:$0xff]  ;;  %v32_v54 = vld [vmem:[%s969_s1 + $0x58] sm:$0xff] }
  0x13   :  { %124 = vmatpush1.msra.mxu0 %v49_v35  ;;  %195 = vmatpush1.msra.mxu1 %v51_v36  ;;  %v29_v55 = vld [vmem:[%s969_s1 + $0x40] sm:$0xff]  ;;  %v31_v56 = vld [vmem:[%s969_s1 + $0x50] sm:$0xff]  ;;  %v26_v57 = vld [vmem:[%s969_s1 + $0x28] sm:$0xff] }
  0x14   :  { %125 = vmatprep.subr.mxu0 %v46_v37  ;;  %196 = vmatprep.subr.mxu1 %v48_v38  ;;  %v28_v58 = vld [vmem:[%s969_s1 + $0x38] sm:$0xff]  ;;  %v25_v59 = vld [vmem:[%s969_s1 + $0x20] sm:$0xff]  ;;  %v27_v60 = vld [vmem:[%s969_s1 + $0x30] sm:$0xff] }
  0x15   :  { %126 = vmatpush1.msra.mxu0 %v45_v39  ;;  %197 = vmatpush1.msra.mxu1 %v47_v40  ;;  %v22_v61 = vld [vmem:[%s969_s1 + $0x8] sm:$0xff]  ;;  %v24_v62 = vld [vmem:[%s969_s1 + $0x18] sm:$0xff]  ;;  %v21_v63 = vld [vmem:[%s969_s1] sm:$0xff] }
  0x16   :  { %127 = vmatprep.subr.mxu0 %v42_v41  ;;  %198 = vmatprep.subr.mxu1 %v44_v42  ;;  %v23_v0 = vld [vmem:[%s969_s1 + $0x10] sm:$0xff]  ;;  %v20_v1 = vld [vmem:[%s970_s0] sm:$0xf]  ;;  %v284_v2 = vld [vmem:[%s971_s3 + $0xf8] sm:$0xff] }
  0x17   :  { %128 = vmatpush1.msra.mxu0 %v41_v43  ;;  %199 = vmatpush1.msra.mxu1 %v43_v44  ;;  %v316_v3 = vld [vmem:[%s971_s3 + $0x1f8] sm:$0xff]  ;;  %v283_v6 = vld [vmem:[%s971_s3 + $0xf0] sm:$0xff]  ;;  %v282_v10 = vld [vmem:[%s971_s3 + $0xe8] sm:$0xff] }
  0x18   :  { %129 = vmatprep.subr.mxu0 %v38_v45  ;;  %200 = vmatprep.subr.mxu1 %v40_v46  ;;  %v268_v4 = vld [vmem:[%s971_s3 + $0x78] sm:$0xff]  ;;  %v315_v7 = vld [vmem:[%s971_s3 + $0x1f0] sm:$0xff]  ;;  %v314_v11 = vld [vmem:[%s971_s3 + $0x1e8] sm:$0xff] }
  0x19   :  { %130 = vmatpush1.msra.mxu0 %v37_v47  ;;  %201 = vmatpush1.msra.mxu1 %v39_v48  ;;  %v300_v5 = vld [vmem:[%s971_s3 + $0x178] sm:$0xff]  ;;  %v267_v8 = vld [vmem:[%s971_s3 + $0x70] sm:$0xff]  ;;  %v266_v12 = vld [vmem:[%s971_s3 + $0x68] sm:$0xff] }
  0x1a   :  { %131 = vmatprep.subr.mxu0 %v34_v49  ;;  %202 = vmatprep.subr.mxu1 %v36_v50  ;;  %v299_v9 = vld [vmem:[%s971_s3 + $0x170] sm:$0xff]  ;;  %v298_v13 = vld [vmem:[%s971_s3 + $0x168] sm:$0xff]  ;;  %v281_v14 = vld [vmem:[%s971_s3 + $0xe0] sm:$0xff] }
  0x1b   :  { %132 = vmatpush1.msra.mxu0 %v33_v51  ;;  %203 = vmatpush1.msra.mxu1 %v35_v52  ;;  %v313_v15 = vld [vmem:[%s971_s3 + $0x1e0] sm:$0xff]  ;;  %v280_v18 = vld [vmem:[%s971_s3 + $0xd8] sm:$0xff]  ;;  %v279_v22 = vld [vmem:[%s971_s3 + $0xd0] sm:$0xff] }
  0x1c   :  { %133 = vmatprep.subr.mxu0 %v30_v53  ;;  %204 = vmatprep.subr.mxu1 %v32_v54  ;;  %v265_v16 = vld [vmem:[%s971_s3 + $0x60] sm:$0xff]  ;;  %v312_v19 = vld [vmem:[%s971_s3 + $0x1d8] sm:$0xff]  ;;  %v311_v23 = vld [vmem:[%s971_s3 + $0x1d0] sm:$0xff] }
  0x1d   :  { %134 = vmatpush1.msra.mxu0 %v29_v55  ;;  %205 = vmatpush1.msra.mxu1 %v31_v56  ;;  %v297_v17 = vld [vmem:[%s971_s3 + $0x160] sm:$0xff]  ;;  %v264_v20 = vld [vmem:[%s971_s3 + $0x58] sm:$0xff]  ;;  %v263_v24 = vld [vmem:[%s971_s3 + $0x50] sm:$0xff] }
  0x1e   :  { %135 = vmatprep.subr.mxu0 %v26_v57  ;;  %206 = vmatprep.subr.mxu1 %v28_v58  ;;  %v296_v21 = vld [vmem:[%s971_s3 + $0x158] sm:$0xff]  ;;  %v295_v25 = vld [vmem:[%s971_s3 + $0x150] sm:$0xff]  ;;  %v278_v26 = vld [vmem:[%s971_s3 + $0xc8] sm:$0xff] }
  0x1f   :  { %136 = vmatpush1.msra.mxu0 %v25_v59  ;;  %207 = vmatpush1.msra.mxu1 %v27_v60  ;;  %v310_v27 = vld [vmem:[%s971_s3 + $0x1c8] sm:$0xff]  ;;  %v277_v30 = vld [vmem:[%s971_s3 + $0xc0] sm:$0xff]  ;;  %v276_v34 = vld [vmem:[%s971_s3 + $0xb8] sm:$0xff] }
  0x20   :  { %137 = vmatprep.subr.mxu0 %v22_v61  ;;  %208 = vmatprep.subr.mxu1 %v24_v62  ;;  %v262_v28 = vld [vmem:[%s971_s3 + $0x48] sm:$0xff]  ;;  %v309_v31 = vld [vmem:[%s971_s3 + $0x1c0] sm:$0xff]  ;;  %v308_v35 = vld [vmem:[%s971_s3 + $0x1b8] sm:$0xff] }
  0x21   :  { %138 = vmatpush1.msra.mxu0 %v21_v63  ;;  %209 = vmatpush1.msra.mxu1 %v23_v0  ;;  %v294_v29 = vld [vmem:[%s971_s3 + $0x148] sm:$0xff]  ;;  %v261_v32 = vld [vmem:[%s971_s3 + $0x40] sm:$0xff]  ;;  %v260_v36 = vld [vmem:[%s971_s3 + $0x38] sm:$0xff] }
  0x22   :  { %172 = vmatmul.mubr.f32.vlgmr.msra.gmra.mxu0 %v20_v1  ;;  %243 = vmatmul.mubr.f32.vlgmr.msra.gmra.mxu1 %v20_v1  ;;  %v293_v33 = vld [vmem:[%s971_s3 + $0x140] sm:$0xff]  ;;  %v292_v37 = vld [vmem:[%s971_s3 + $0x138] sm:$0xff]  ;;  %v275_v38 = vld [vmem:[%s971_s3 + $0xb0] sm:$0xff] }
  0x23   :  { %471 = vmatprep.subr.mxu0 %v284_v2  ;;  %506 = vmatprep.subr.mxu1 %v316_v3  ;;  %v307_v39 = vld [vmem:[%s971_s3 + $0x1b0] sm:$0xff]  ;;  %v274_v42 = vld [vmem:[%s971_s3 + $0xa8] sm:$0xff]  ;;  %v273_v46 = vld [vmem:[%s971_s3 + $0xa0] sm:$0xff]  ;;  %v87_v2 = vlaneseq }
  0x24   :  { %472 = vmatpush3.msra.mxu0 %v268_v4  ;;  %507 = vmatpush3.msra.mxu1 %v300_v5  ;;  %v259_v40 = vld [vmem:[%s971_s3 + $0x30] sm:$0xff]  ;;  %v306_v43 = vld [vmem:[%s971_s3 + $0x1a8] sm:$0xff]  ;;  %v305_v47 = vld [vmem:[%s971_s3 + $0x1a0] sm:$0xff] }
  0x25   :  { %473 = vmatprep.subr.mxu0 %v283_v6  ;;  %508 = vmatprep.subr.mxu1 %v315_v7  ;;  %v291_v41 = vld [vmem:[%s971_s3 + $0x130] sm:$0xff]  ;;  %v258_v44 = vld [vmem:[%s971_s3 + $0x28] sm:$0xff]  ;;  %v257_v48 = vld [vmem:[%s971_s3 + $0x20] sm:$0xff]  ;;  %v88_v3 = vshrl.u32 %v87_v2, 7 }
  0x26   :  { %474 = vmatpush3.msra.mxu0 %v267_v8  ;;  %509 = vmatpush3.msra.mxu1 %v299_v9  ;;  %v290_v45 = vld [vmem:[%s971_s3 + $0x128] sm:$0xff]  ;;  %v289_v49 = vld [vmem:[%s971_s3 + $0x120] sm:$0xff]  ;;  %v272_v50 = vld [vmem:[%s971_s3 + $0x98] sm:$0xff] }
  0x27   :  { %475 = vmatprep.subr.mxu0 %v282_v10  ;;  %510 = vmatprep.subr.mxu1 %v314_v11  ;;  %v304_v51 = vld [vmem:[%s971_s3 + $0x198] sm:$0xff]  ;;  %v271_v54 = vld [vmem:[%s971_s3 + $0x90] sm:$0xff]  ;;  %v270_v58 = vld [vmem:[%s971_s3 + $0x88] sm:$0xff]  ;;  %v97_v4 = vsub.s32 2, %v88_v3  ;;  %v89_v5 = vsub.s32 0, %v88_v3  ;;  %v93_v7 = vsub.s32 1, %v88_v3 }
  0x28   :  { %476 = vmatpush3.msra.mxu0 %v266_v12  ;;  %511 = vmatpush3.msra.mxu1 %v298_v13  ;;  %v256_v52 = vld [vmem:[%s971_s3 + $0x18] sm:$0xff]  ;;  %v303_v55 = vld [vmem:[%s971_s3 + $0x190] sm:$0xff]  ;;  %v302_v59 = vld [vmem:[%s971_s3 + $0x188] sm:$0xff]  ;;  %v101_v8 = vsub.s32 3, %v88_v3 }
  0x29   :  { %477 = vmatprep.subr.mxu0 %v281_v14  ;;  %512 = vmatprep.subr.mxu1 %v313_v15  ;;  %v288_v53 = vld [vmem:[%s971_s3 + $0x118] sm:$0xff]  ;;  %v255_v56 = vld [vmem:[%s971_s3 + $0x10] sm:$0xff]  ;;  %v254_v60 = vld [vmem:[%s971_s3 + $0x8] sm:$0xff] }
  0x2a   :  { %478 = vmatpush3.msra.mxu0 %v265_v16  ;;  %513 = vmatpush3.msra.mxu1 %v297_v17  ;;  %v287_v57 = vld [vmem:[%s971_s3 + $0x110] sm:$0xff]  ;;  %v286_v61 = vld [vmem:[%s971_s3 + $0x108] sm:$0xff]  ;;  %v269_v62 = vld [vmem:[%s971_s3 + $0x80] sm:$0xff] }
  0x2b   :  { %479 = vmatprep.subr.mxu0 %v280_v18  ;;  %514 = vmatprep.subr.mxu1 %v312_v19  ;;  %v301_v63 = vld [vmem:[%s971_s3 + $0x180] sm:$0xff] }
  0x2c   :  { %480 = vmatpush3.msra.mxu0 %v264_v20  ;;  %515 = vmatpush3.msra.mxu1 %v296_v21  ;;  %v253_v0 = vld [vmem:[%s971_s3] sm:$0xff] }
  0x2d   :  { %481 = vmatprep.subr.mxu0 %v279_v22  ;;  %516 = vmatprep.subr.mxu1 %v311_v23  ;;  %v285_v1 = vld [vmem:[%s971_s3 + $0x100] sm:$0xff] }
  0x2e   :  { %482 = vmatpush3.msra.mxu0 %v263_v24  ;;  %517 = vmatpush3.msra.mxu1 %v295_v25  ;;  %v85_v6 = vld [vmem:[%s972_s2] sm:$0xf] }
  0x2f   :  { %483 = vmatprep.subr.mxu0 %v278_v26  ;;  %518 = vmatprep.subr.mxu1 %v310_v27  ;;  %v98_v9 = vrot.slane %v85_v6, %v97_v4  ;;  %v90_v10 = vrot.slane %v85_v6, %v89_v5  ;;  %v94_v11 = vrot.slane %v85_v6, %v93_v7  ;;  %v470_v27 = vld [vmem:[%s973_s4] ss:$0 sm:$0xff] }
  0x30   :  { %484 = vmatpush3.msra.mxu0 %v262_v28  ;;  %519 = vmatpush3.msra.mxu1 %v294_v29  ;;  %v102_v12 = vrot.slane %v85_v6, %v101_v8 }
  0x31   :  { %485 = vmatprep.subr.mxu0 %v277_v30  ;;  %520 = vmatprep.subr.mxu1 %v309_v31 }
  0x32   :  { %486 = vmatpush3.msra.mxu0 %v261_v32  ;;  %521 = vmatpush3.msra.mxu1 %v293_v33 }
  0x33   :  { %487 = vmatprep.subr.mxu0 %v276_v34  ;;  %522 = vmatprep.subr.mxu1 %v308_v35 }
  0x34   :  { %488 = vmatpush3.msra.mxu0 %v260_v36  ;;  %523 = vmatpush3.msra.mxu1 %v292_v37 }
  0x35   :  { %489 = vmatprep.subr.mxu0 %v275_v38  ;;  %524 = vmatprep.subr.mxu1 %v307_v39 }
  0x36   :  { %490 = vmatpush3.msra.mxu0 %v259_v40  ;;  %525 = vmatpush3.msra.mxu1 %v291_v41 }
  0x37   :  { %491 = vmatprep.subr.mxu0 %v274_v42  ;;  %526 = vmatprep.subr.mxu1 %v306_v43 }
  0x38   :  { %492 = vmatpush3.msra.mxu0 %v258_v44  ;;  %527 = vmatpush3.msra.mxu1 %v290_v45 }
  0x39   :  { %493 = vmatprep.subr.mxu0 %v273_v46  ;;  %528 = vmatprep.subr.mxu1 %v305_v47 }
  0x3a   :  { %494 = vmatpush3.msra.mxu0 %v257_v48  ;;  %529 = vmatpush3.msra.mxu1 %v289_v49 }
  0x3b   :  { %495 = vmatprep.subr.mxu0 %v272_v50  ;;  %530 = vmatprep.subr.mxu1 %v304_v51 }
  0x3c   :  { %496 = vmatpush3.msra.mxu0 %v256_v52  ;;  %531 = vmatpush3.msra.mxu1 %v288_v53 }
  0x3d   :  { %497 = vmatprep.subr.mxu0 %v271_v54  ;;  %532 = vmatprep.subr.mxu1 %v303_v55 }
  0x3e   :  { %498 = vmatpush3.msra.mxu0 %v255_v56  ;;  %533 = vmatpush3.msra.mxu1 %v287_v57 }
  0x3f   :  { %499 = vmatprep.subr.mxu0 %v270_v58  ;;  %534 = vmatprep.subr.mxu1 %v302_v59 }
  0x40   :  { %500 = vmatpush3.msra.mxu0 %v254_v60  ;;  %535 = vmatpush3.msra.mxu1 %v286_v61 }
  0x41   :  { %501 = vmatprep.subr.mxu0 %v269_v62  ;;  %536 = vmatprep.subr.mxu1 %v301_v63 }
  0x42   :  { %502 = vmatpush3.msra.mxu0 %v253_v0  ;;  %537 = vmatpush3.msra.mxu1 %v285_v1 }
  0xe2   :  { %v173_v13 = vpop.f32.mrf.mxu0  ;;  %v244_v14 = vpop.f32.mrf.mxu1 }
  0xe3   :  { %v245_v15 = vadd.f32 %v244_v14, %v98_v9  ;;  %v174_v16 = vadd.f32 %v173_v13, %v90_v10 }
  0xe4   :  { %v175_v17 = vpop.f32.mrf.mxu0  ;;  %v246_v18 = vpop.f32.mrf.mxu1 }
  0xe5   :  { %v176_v19 = vadd.f32 %v175_v17, %v94_v11  ;;  %v247_v20 = vadd.f32 %v246_v18, %v102_v12  ;;  %v251_v21 = vmax.f32 %v245_v15, 0.0  ;;  %v249_v24 = vmax.f32 %v174_v16, 0.0 }
  0xe7   :  { %v250_v22 = vmax.f32 %v176_v19, 0.0  ;;  %v252_v23 = vmax.f32 %v247_v20, 0.0 }
  0xe9   :  { %388 = vmatprep.mubr.f32.mxu0 %v250_v22  ;;  %458 = vmatprep.mubr.f32.mxu1 %v252_v23 }
  0xea   :  { %389 = vmatmul.mubr.f32.vlgmr.msra.gmra.mxu0 %v249_v24  ;;  %459 = vmatmul.mubr.f32.vlgmr.msra.gmra.mxu1 %v251_v21 }
 0x1aa   :  { %v503_v25 = vpop.f32.mrf.mxu0  ;;  %v538_v26 = vpop.f32.mrf.mxu1 }
 0x1ac   :  { %v504_v28 = vpop.f32.mrf.mxu0  ;;  %v539_v29 = vpop.f32.mrf.mxu1 }
 0x1ad   :  { %v505_v30 = vadd.f32 %v504_v28, %v503_v25  ;;  %v540_v32 = vadd.f32 %v539_v29, %v538_v26 }
 0x1af   :  { %v391_v31 = vadd.f32 %v505_v30, %v470_v27 }
 0x1b1   :  { %v461_v33 = vadd.f32 %v540_v32, %v391_v31 }
 0x1b3   :  { %465 = vst.msk [vmem:[%s974_s5] sm:$0xf] %vm464_vm0, %v461_v33 }

</bundles_post_ra>
